<compile_context>
chip_gen: v5e
topology: v5e:2x2
jax: 0.10.0
libtpu: 0.0.40
codegen_flags: <defaults>
</compile_context>

<pallas_src>
import jax
import jax.numpy as jnp
import numpy as np
from jax.experimental import pallas as pl
from jax.experimental.pallas import tpu as pltpu


def _round_up(x: int, m: int) -> int:
    return (x + m - 1) // m * m


def _sublane_multiple(dtype) -> int:
    # Packed-sublane tiling: 4-byte -> 8 rows, 2-byte (bf16) -> 16, 1-byte -> 32.
    return {4: 8, 2: 16, 1: 32}[jnp.dtype(dtype).itemsize]


def _vmem_cap_bytes() -> int:
    """Generation-aware scoped-VMEM cap: physical VMEM minus ~16 MiB headroom.

    v5e/v6e (128 MiB physical) -> ~112 MiB, v7x (64 MiB physical) -> ~48 MiB.
    Falls back to 48 MiB (safe on every generation) if the query fails.
    """
    headroom = 16 * 1024 * 1024
    cap = 48 * 1024 * 1024
    try:
        cap = int(pltpu.get_tpu_info().vmem_capacity_bytes) - headroom
    except Exception:
        pass
    return int(max(32 * 1024 * 1024, min(cap, 112 * 1024 * 1024)))


# ---------------------------------------------------------------------------
# Kernels
# ---------------------------------------------------------------------------
def _linear_fullk_kernel(x_ref, w_ref, b_ref, o_ref):
    """One (tm, tn) output tile; full-K weight panel resident in VMEM."""
    acc = jnp.dot(x_ref[...], w_ref[...], preferred_element_type=jnp.float32)
    o_ref[...] = (acc + b_ref[...].astype(jnp.float32)).astype(o_ref.dtype)


def _linear_ktiled_f32_kernel(x_ref, w_ref, b_ref, o_ref):
    """K-tiled reduction, f32 output: accumulate directly into the output tile
    (no accumulator scratch, no extra epilogue copy)."""
    k = pl.program_id(2)

    @pl.when(k == 0)
    def _init():
        o_ref[...] = jnp.broadcast_to(
            b_ref[...].astype(o_ref.dtype), o_ref.shape)

    o_ref[...] += jnp.dot(x_ref[...], w_ref[...],
                          preferred_element_type=jnp.float32)


def _linear_ktiled_kernel(x_ref, w_ref, b_ref, o_ref, acc_ref):
    """K-tiled reduction with an f32 accumulator (low-precision outputs)."""
    k = pl.program_id(2)

    @pl.when(k == 0)
    def _init():
        acc_ref[...] = jnp.zeros_like(acc_ref)

    acc_ref[...] += jnp.dot(x_ref[...], w_ref[...],
                            preferred_element_type=jnp.float32)

    @pl.when(k == pl.num_programs(2) - 1)
    def _finalize():
        o_ref[...] = (
            acc_ref[...] + b_ref[...].astype(jnp.float32)
        ).astype(o_ref.dtype)


# ---------------------------------------------------------------------------
# Wrapper
# ---------------------------------------------------------------------------
def pallas_linear(x, w, b, *, tm=512, tn=512, tk=1024,
                  compute_dtype=None, allow_full_k=True):
    """out = x @ w + b with DataParallel semantics (batch chunked on dim 0,
    shared/resident weights, chunks gathered back on dim 0)."""
    B, D_in = x.shape
    Kw, D_out = w.shape
    assert Kw == D_in and b.shape == (D_out,)

    out_dtype = x.dtype
    if compute_dtype is not None and jnp.dtype(compute_dtype) != x.dtype:
        # bf16 MXU path: halve HBM traffic, keep f32 accumulation + f32 bias.
        x = x.astype(compute_dtype)
        w = w.astype(compute_dtype)
    in_dtype = x.dtype
    in_item = jnp.dtype(in_dtype).itemsize
    out_item = jnp.dtype(out_dtype).itemsize
    sub = _sublane_multiple(in_dtype)

    cap = _vmem_cap_bytes()

    # Tile clamps: lane dims to 128 multiples, batch rows to the sublane pack
    # of the compute dtype (8 f32 / 16 bf16 / 32 int8-fp8).
    tm = min(tm, _round_up(B, sub))
    tn = min(tn, _round_up(D_out, 128))
    Bp = _round_up(B, tm)
    Np = _round_up(D_out, tn)

    # Megacore (v7x has 2 TensorCores): keep >= 2 steps on a parallel axis
    # when the whole problem would otherwise be a single grid point.
    if Bp // tm == 1 and Np // tn == 1 and Np >= 256:
        half = (Np // 2) // 128 * 128
        tn = half if (half >= 128 and Np % half == 0) else 128

    # Path selection: keep the full K panel resident in VMEM whenever it fits
    # (no reduction axis, weights DMAed once per column panel), otherwise fall
    # back to a K-tiled reduction grid.
    fullk_foot = (2 * (tm * D_in + D_in * tn) * in_item
                  + 2 * tm * tn * out_item + 2 * tn * 4)
    use_full_k = allow_full_k and fullk_foot <= int(0.9 * cap)

    if use_full_k:
        Kp = D_in                      # no K padding needed (block == full dim)
    else:
        tk = min(tk, _round_up(D_in, 128))
        Kp = _round_up(D_in, tk)

    # Pad only what actually needs it (padding is an extra HBM pass).
    xp = x if (Bp == B and Kp == D_in) else jnp.pad(
        x, ((0, Bp - B), (0, Kp - D_in)))
    wp = w if (Kp == D_in and Np == D_out) else jnp.pad(
        w, ((0, Kp - D_in), (0, Np - D_out)))
    bp = (b if Np == D_out else jnp.pad(b, (0, Np - D_out))).reshape(1, Np)

    flops = 2 * Bp * Kp * Np

    if use_full_k:
        grid = (Np // tn, Bp // tm)    # j outer, i inner -> w resident over i
        vmem_limit = int(min(cap, max(32 * 1024 * 1024,
                                      fullk_foot + 4 * 1024 * 1024)))
        bytes_accessed = (Bp * Kp * in_item * (Np // tn)   # x streamed per j
                          + Kp * Np * in_item              # w read once
                          + Bp * Np * out_item             # out written once
                          + Np * 4 * (Np // tn))           # bias per j panel
        out_p = pl.pallas_call(
            _linear_fullk_kernel,
            out_shape=jax.ShapeDtypeStruct((Bp, Np), out_dtype),
            grid_spec=pltpu.PrefetchScalarGridSpec(
                num_scalar_prefetch=0,
                grid=grid,
                in_specs=[
                    # x: one batch chunk per inner step -> the "scatter".
                    pl.BlockSpec((tm, Kp), lambda j, i: (i, 0)),
                    # w: block index independent of i -> fetched once per j,
                    #    genuinely resident across the batch chunks.
                    pl.BlockSpec((Kp, tn), lambda j, i: (0, j)),
                    pl.BlockSpec((1, tn), lambda j, i: (0, j)),
                ],
                # out: each chunk written in place -> the "gather".
                out_specs=pl.BlockSpec((tm, tn), lambda j, i: (i, j)),
            ),
            compiler_params=pltpu.CompilerParams(
                dimension_semantics=("parallel", "parallel"),
                vmem_limit_bytes=vmem_limit,
            ),
            cost_estimate=pl.CostEstimate(
                flops=flops, transcendentals=0,
                bytes_accessed=int(bytes_accessed)),
        )(xp, wp, bp)
    else:
        grid = (Bp // tm, Np // tn, Kp // tk)
        use_scratch = jnp.dtype(out_dtype) != jnp.dtype(jnp.float32)
        foot = (2 * (tm * tk + tk * tn) * in_item
                + 2 * tm * tn * out_item
                + (tm * tn * 4 if use_scratch else 0) + 2 * tn * 4)
        vmem_limit = int(min(cap, max(32 * 1024 * 1024,
                                      foot + 4 * 1024 * 1024)))
        bytes_accessed = (Bp * Kp * in_item * (Np // tn)
                          + Kp * Np * in_item * (Bp // tm)
                          + Bp * Np * out_item)
        kernel = _linear_ktiled_kernel if use_scratch else _linear_ktiled_f32_kernel
        scratch = [pltpu.VMEM((tm, tn), jnp.float32)] if use_scratch else []
        out_p = pl.pallas_call(
            kernel,
            out_shape=jax.ShapeDtypeStruct((Bp, Np), out_dtype),
            grid_spec=pltpu.PrefetchScalarGridSpec(
                num_scalar_prefetch=0,
                grid=grid,
                in_specs=[
                    pl.BlockSpec((tm, tk), lambda i, j, k: (i, k)),
                    pl.BlockSpec((tk, tn), lambda i, j, k: (k, j)),
                    pl.BlockSpec((1, tn), lambda i, j, k: (0, j)),
                ],
                out_specs=pl.BlockSpec((tm, tn), lambda i, j, k: (i, j)),
                scratch_shapes=scratch,
            ),
            compiler_params=pltpu.CompilerParams(
                dimension_semantics=("parallel", "parallel", "arbitrary"),
                vmem_limit_bytes=vmem_limit,
            ),
            cost_estimate=pl.CostEstimate(
                flops=flops, transcendentals=0,
                bytes_accessed=int(bytes_accessed)),
        )(xp, wp, bp)

    # Only pay the slice pass if padding was actually added.
    if Bp != B or Np != D_out:
        out_p = out_p[:B, :D_out]
    return out_p


class DataParallelLinear:
    """Pallas analogue of DataParallel(nn.Linear(D_in, D_out, bias=True)).

    forward(x) == x @ w + b; the batch is chunked along dim 0 by the kernel's
    grid / BlockSpecs and the weights are shared (VMEM-resident) across chunks.
    """

    def __init__(self, w, b, *, tm=512, tn=512, tk=1024, compute_dtype=None):
        self.w, self.b = w, b
        self._kw = dict(tm=tm, tn=tn, tk=tk, compute_dtype=compute_dtype)

    def __call__(self, x):
        return pallas_linear(x, self.w, self.b, **self._kw)


if __name__ == "__main__":
    key = jax.random.PRNGKey(0)
    kx, kw, kb, kx2, kw2, kb2 = jax.random.split(key, 6)

    # 1) Small f32 problem (full-K, resident-weight path).
    B, D_in, D_out = 8, 32, 64
    x = jax.random.normal(kx, (B, D_in), dtype=jnp.float32)
    w = (jax.random.normal(kw, (D_in, D_out), dtype=jnp.float32)
         / np.sqrt(D_in).astype(np.float32))
    b = jax.random.normal(kb, (D_out,), dtype=jnp.float32)

    net = DataParallelLinear(w, b)
    out = jax.block_until_ready(net(x))
    ref = x @ w + b
    np.testing.assert_allclose(np.asarray(out), np.asarray(ref),
                               rtol=1e-5, atol=1e-5)

    # 2) K-tiled reduction path (forced) with ragged output dim.
    B2, D_in2, D_out2 = 64, 384, 192
    x2 = jax.random.normal(kx2, (B2, D_in2), dtype=jnp.float32)
    w2 = (jax.random.normal(kw2, (D_in2, D_out2), dtype=jnp.float32)
          / np.sqrt(D_in2).astype(np.float32))
    b2 = jax.random.normal(kb2, (D_out2,), dtype=jnp.float32)
    out2 = jax.block_until_ready(
        pallas_linear(x2, w2, b2, tm=64, tn=128, tk=128, allow_full_k=False))
    ref2 = np.asarray(x2) @ np.asarray(w2) + np.asarray(b2)
    np.testing.assert_allclose(np.asarray(out2), ref2, rtol=1e-4, atol=1e-4)

    # 3) bf16 MXU compute path (f32 accumulation, f32 output, 16-row sublanes).
    out3 = jax.block_until_ready(
        pallas_linear(x, w, b, compute_dtype=jnp.bfloat16))
    xb = np.asarray(x.astype(jnp.bfloat16).astype(jnp.float32))
    wb = np.asarray(w.astype(jnp.bfloat16).astype(jnp.float32))
    ref3 = xb @ wb + np.asarray(b)
    np.testing.assert_allclose(np.asarray(out3), ref3, rtol=1e-3, atol=1e-3)

    print("KERNEL_OK")
</pallas_src>

<mosaic_0001>
module attributes {stable_mosaic.version = 11 : i64} {
  func.func @_linear_fullk_kernel(%arg0: i32, %arg1: i32, %arg2: memref<8x32xf32, #tpu.memory_space<vmem>>, %arg3: memref<32x128xf32, #tpu.memory_space<vmem>>, %arg4: memref<1x128xf32, #tpu.memory_space<vmem>>, %arg5: memref<8x128xf32, #tpu.memory_space<vmem>>) attributes {dimension_semantics = [#tpu.dimension_semantics<parallel>, #tpu.dimension_semantics<parallel>], iteration_bounds = array<i64: 1, 1>, scalar_prefetch = 0 : i64, scratch_operands = 0 : i64, tpu.core_type = #tpu.core_type<tc>, window_params = [{transform_indices = @transform_0, window_bounds = array<i64: 8, 32>}, {transform_indices = @transform_1, window_bounds = array<i64: 32, 128>}, {transform_indices = @transform_2, window_bounds = array<i64: 1, 128>}, {transform_indices = @transform_3, window_bounds = array<i64: 8, 128>}]} {
    %c0 = arith.constant 0 : index
    %c0_0 = arith.constant 0 : index
    %0 = vector.load %arg2[%c0, %c0_0] : memref<8x32xf32, #tpu.memory_space<vmem>>, vector<8x32xf32>
    %c0_1 = arith.constant 0 : index
    %c0_2 = arith.constant 0 : index
    %1 = vector.load %arg3[%c0_1, %c0_2] : memref<32x128xf32, #tpu.memory_space<vmem>>, vector<32x128xf32>
    %cst = arith.constant dense<0.000000e+00> : vector<8x128xf32>
    %2 = tpu.matmul %0, %1, %cst {dimension_numbers = #tpu.dot_dimension_numbers<[1], [0], [0], [1], [0, 0, 1, 1], [], []>} : vector<8x32xf32>, vector<32x128xf32>, vector<8x128xf32> -> vector<8x128xf32>
    %c0_3 = arith.constant 0 : index
    %c0_4 = arith.constant 0 : index
    %3 = vector.load %arg4[%c0_3, %c0_4] : memref<1x128xf32, #tpu.memory_space<vmem>>, vector<1x128xf32>
    %4 = vector.broadcast %3 : vector<1x128xf32> to vector<8x128xf32>
    %5 = arith.addf %2, %4 : vector<8x128xf32>
    %c0_5 = arith.constant 0 : index
    %c0_6 = arith.constant 0 : index
    %6 = vector.load %arg5[%c0_5, %c0_6] : memref<8x128xf32, #tpu.memory_space<vmem>>, vector<8x128xf32>
    tpu.vector_store %arg5[%c0_5, %c0_6], %5 {strides = array<i32>} : memref<8x128xf32, #tpu.memory_space<vmem>>, vector<8x128xf32>,
    return
  }
  func.func @transform_0(%arg0: i32, %arg1: i32) -> (i32, i32) {
    %c0_i32 = arith.constant 0 : i32
    %c0_i32_0 = arith.constant 0 : i32
    return %arg1, %c0_i32 : i32, i32
  }
  func.func @transform_1(%arg0: i32, %arg1: i32) -> (i32, i32) {
    %c0_i32 = arith.constant 0 : i32
    %c0_i32_0 = arith.constant 0 : i32
    return %c0_i32, %arg0 : i32, i32
  }
  func.func @transform_2(%arg0: i32, %arg1: i32) -> (i32, i32) {
    %c0_i32 = arith.constant 0 : i32
    %c0_i32_0 = arith.constant 0 : i32
    return %c0_i32, %arg0 : i32, i32
  }
  func.func @transform_3(%arg0: i32, %arg1: i32) -> (i32, i32) {
    %c0_i32 = arith.constant 0 : i32
    return %arg1, %arg0 : i32, i32
  }
}

</mosaic_0001>

<bundles_post_ra>
// kernel: tpu_custom_call.1
= control target key start
LH: loop header
LB: loop body
LE: loop exit
PB: predicated region body
PF: predicated region fallthrough
CT: control target
= control target key end

     0   :  { %8 = vsyncpa [#allocation3], 0  ;;  %s219_s0 = inlined_call_operand.hbm [shape: f32[8,32], index: 0, kind: input, shape index: {}]   ;;  %s220_s1 = inlined_call_operand.hbm [shape: f32[32,128], index: 1, kind: input, shape index: {}]   ;;  %s221_s2 = inlined_call_operand.vmem [shape: f32[1,128], index: 2, kind: input, shape index: {}]   ;;  %s222_s3 = inlined_call_operand.hbm [shape: f32[8,128], index: 3, kind: output, shape index: {}]  }
   0x1   :  { %9 = vsyncpa [#allocation6], 0 }
   0x2   :  { %10 = vsyncpa [#allocation4], 0  ;;  %s16_s14 = sshll.u32 %s219_s0, 4  ;;  %s182_s15 = smov [#allocation2]   ;;  %s17_s14 = int_to_ptr.hbm [resolvable:$true] %s16_s14 }
   0x3   :  { %s18_s16 = sshll.u32 %s182_s15, 4  ;;  %s26_s19 = sshll.u32 %s220_s1, 4  ;;  %s19_s16 = int_to_ptr.vmem [resolvable:$true] %s18_s16  ;;  %s27_s19 = int_to_ptr.hbm [resolvable:$true] %s26_s19 }
   0x4   :  { %21 = dma.hbm_to_vmem [thread:$0]  %s17_s14, 128, %s19_s16, [#allocation3]  }
   0x5   :  { %s183_s20 = smov [#allocation5]   ;;  %s184_s22 = smov 128  }
   0x6   :  { %s28_s21 = sshll.u32 %s183_s20, 4  ;;  %s185_s23 = smov 8   ;;  %s29_s21 = int_to_ptr.vmem [resolvable:$true] %s28_s21 }
   0x7   :  { %34 = dma.hbm_to_vmem [thread:$0]  %s27_s19, 512, %s29_s21, [#allocation6], %s184_s22, %s184_s22, %s185_s23  }
   0x8   :  { %176 = dma.done.wait [#allocation3], 128  }
   0x9   :  { %177 = vsyncadd [#allocation3], 4294967168 }
   0xa   :  { %178 = dma.done.wait [#allocation6], 512  }
   0xb   :  { %179 = vsyncadd [#allocation6], 4294966784  ;;  %v49_v0 = vld [vmem:[#allocation5 + $0x18] sm:$0xff]  ;;  %v48_v1 = vld [vmem:[#allocation5 + $0x10] sm:$0xff]  ;;  %vm54_vm0 = vcmask 261120   ;;  %s186_s24 = smov [#allocation7]  }
   0xc   :  { %70 = vmatpush.msra.mxu0 %v49_v0  ;;  %v47_v2 = vld [vmem:[#allocation5 + $0x8] sm:$0xff]  ;;  %v46_v3 = vld [vmem:[#allocation5] sm:$0xff]  ;;  %v45_v4 = vld [vmem:[#allocation2] sm:$0xff]  ;;  %s84_s25 = sshll.u32 %s186_s24, 4  ;;  %s86_s28 = sshll.u32 %s222_s3, 4  ;;  %s85_s25 = int_to_ptr.vmem [resolvable:$true] %s84_s25  ;;  %s87_s28 = int_to_ptr.hbm [resolvable:$true] %s86_s28 }
   0xd   :  { %v103_v5 = vld [vmem:[%s221_s2] ss:$0 sm:$0xff] }
   0xe   :  { %71 = vmatpush.msra.mxu0 %v48_v1 }
  0x10   :  { %72 = vmatpush.msra.mxu0 %v47_v2 }
  0x12   :  { %73 = vmatpush.msra.mxu0 %v46_v3 }
  0x13   :  { %97 = vmatmul.msk.f32.vlgmr.msra.gmra.mxu0 %vm54_vm0, %v45_v4 }
  0x90   :  { %v75_v6 = vpop.f32.mrf.mxu0 }
  0x91   :  { %v76_v7 = vadd.f32 %v103_v5, %v75_v6 }
  0x93   :  { %78 = vst [vmem:[#allocation7] sm:$0xff] %v76_v7 }
  0x94   :  { %89 = dma.vmem_to_hbm [thread:$0]  %s85_s25, 128, %s87_s28, [#allocation4]  }
  0x95   :  { %180 = dma.done.wait [#allocation4], 128  }
  0x96   :  { %181 = vsyncadd [#allocation4], 4294967168 }
  0x97   :  { %94 = vsyncpa [#allocation3], 1 }
  0x98   :  { %95 = vsyncpa [#allocation6], 1 }
  0x99   :  { %96 = vsyncpa [#allocation4], 1 }

</bundles_post_ra>
